<compile_context>
chip_gen: v7x
topology: tpu7x:2x2x1
jax: 0.10.0
libtpu: 0.0.40
codegen_flags: <defaults>
</compile_context>

<pallas_src>
import math

import jax
import jax.numpy as jnp
from jax.experimental import pallas as pl
from jax.experimental.pallas import tpu as pltpu


# ----------------------------- helpers -------------------------------------

def _rmax(a):
    # (S, 128) -> (1, 1): lane reduction, then sublane reduction.
    return jnp.max(jnp.max(a, axis=-1, keepdims=True), axis=-2, keepdims=True)


def _rsum(a):
    return jnp.sum(jnp.sum(a, axis=-1, keepdims=True), axis=-2, keepdims=True)


# ------------------------------ kernel -------------------------------------

def _make_psap_kernel(c1, c2, ch, hw, hwb, padded):
    inv_hw = 1.0 / float(hw)

    def kernel(x_ref, wqr_ref, wvr_ref, wup_ref, wql_ref, wvl_ref, o_ref):
        # x_ref: (C1, HWB, 128) for the current batch.  Per-channel rows are
        # (HWB, 128) values, so all heavy elementwise work is sublane+lane dense.
        xr = [x_ref[c].astype(jnp.float32) for c in range(c1)]

        if padded:
            pos = (jax.lax.broadcasted_iota(jnp.int32, (hwb, 128), 0) * 128
                   + jax.lax.broadcasted_iota(jnp.int32, (hwb, 128), 1))
            valid = pos < hw
        else:
            valid = None

        def conv1x1(w_ref, co, ci, rows):
            # 1x1 conv == channel contraction with SMEM-scalar weights,
            # statically unrolled (co, ci are tiny; MXU would pad K for nothing).
            outs = []
            for o in range(co):
                acc = rows[0] * w_ref[o * ci]
                for c in range(1, ci):
                    acc = acc + rows[c] * w_ref[o * ci + c]
                outs.append(acc)
            return outs

        def softmax_hw(s):
            # Softmax over the whole (padded) HW tile; padded tail masked out.
            if valid is not None:
                s = jnp.where(valid, s, jnp.float32(-1e30))
            m = _rmax(s)
            e = jnp.exp(s - m)
            if valid is not None:
                e = jnp.where(valid, e, 0.0)
            inv = 1.0 / _rsum(e)          # (1,1) divide; applied as a multiply
            return e * inv

        # ---------------- spatial_pool (on the original x) ----------------
        input_x = conv1x1(wvr_ref, ch, c1, xr)               # ch x (HWB, 128)
        cmask = softmax_hw(conv1x1(wqr_ref, 1, c1, xr)[0])   # (HWB, 128)
        context = [_rsum(input_x[o] * cmask) for o in range(ch)]   # ch x (1,1)
        ctx_s = []
        for o in range(c2):                                  # conv_up + sigmoid
            acc = context[0] * wup_ref[o * ch]
            for c in range(1, ch):
                acc = acc + context[c] * wup_ref[o * ch + c]
            ctx_s.append(1.0 / (1.0 + jnp.exp(-acc)))        # (1,1) scalars
        x1 = [xr[c] * ctx_s[c] for c in range(c1)]           # requires c2 == c1

        # ------ channel_pool (on the in-place-updated x, as in PyTorch) -----
        g_x = conv1x1(wql_ref, ch, c1, x1)
        theta_x = conv1x1(wvl_ref, ch, c1, x1)
        s = _rsum(g_x[0]) * inv_hw * theta_x[0]
        for o in range(1, ch):
            s = s + _rsum(g_x[o]) * inv_hw * theta_x[o]      # (HWB, 128)
        sm = softmax_hw(s)
        # forward() returns spatial_pool(x) + channel_pool(x); both alias the
        # same mutated tensor, so the result is 2 * x1 * sigmoid(sm).
        # 2*sigmoid(t) == 1 + tanh(t/2): doubles on the (1,HW) context row and
        # replaces the full-array divide with an EUP tanh.
        ctx_c2 = 1.0 + jnp.tanh(0.5 * sm)
        for c in range(c1):
            o_ref[c] = (x1[c] * ctx_c2).astype(o_ref.dtype)

    return kernel


# ----------------------------- wrapper -------------------------------------

def psap_forward(x, wqr, wvr, wup, wql, wvl):
    """x: (B, C1, H, W); 1x1-conv weights given as (out, in) matrices."""
    B, C1, H, W = x.shape
    C2, ch = wup.shape
    assert C2 == C1, "PSAP's in-place `x *= context` broadcast requires c2 == c1"
    assert wqr.shape == (1, C1) and wvr.shape == (ch, C1)
    assert wql.shape == (ch, C1) and wvl.shape == (ch, C1)

    HW = H * W
    HWp = ((HW + 127) // 128) * 128        # lane-dense: HW padded to mult of 128
    HWB = HWp // 128
    padded = HWp != HW

    x3 = x.reshape(B, C1, HW)
    if padded:
        x3 = jnp.pad(x3, ((0, 0), (0, 0), (0, HWp - HW)))
    x4 = x3.reshape(B, C1, HWB, 128)

    # Tiny 1x1-conv weights -> flat f32 vectors living in SMEM (scalar FMAs).
    w_flat = [w.astype(jnp.float32).reshape(-1) for w in (wqr, wvr, wup, wql, wvl)]

    kernel = _make_psap_kernel(C1, C2, ch, HW, HWB, padded)

    itemsize = jnp.dtype(x.dtype).itemsize
    flops = int(B * (8 * ch * C1 * HWp + 12 * C1 * HWp + 6 * ch * HWp + 16 * HWp))
    transcendentals = int(B * (2 * HWp + C2))
    bytes_accessed = int(2 * x4.size * itemsize + 4 * sum(w.size for w in w_flat))

    x_spec = pl.BlockSpec((None, C1, HWB, 128), lambda b: (b, 0, 0, 0))
    o_spec = pl.BlockSpec((None, C1, HWB, 128), lambda b: (b, 0, 0, 0))
    smem_spec = pl.BlockSpec(memory_space=pltpu.MemorySpace.SMEM)

    # Rough per-step VMEM: double-buffered in/out blocks + live f32 temporaries.
    blk_bytes = C1 * HWB * 128 * itemsize
    blk_f32 = C1 * HWB * 128 * 4
    vmem_need = 4 * blk_bytes + 10 * blk_f32
    extra = {}
    if vmem_need > 30 * 1024 * 1024:
        # TODO(synk): switch to a two-pass HW-tiled path for very large H*W.
        extra["vmem_limit_bytes"] = int(min(vmem_need * 3 // 2, 100 * 1024 * 1024))

    out = pl.pallas_call(
        kernel,
        out_shape=jax.ShapeDtypeStruct((B, C1, HWB, 128), x.dtype),
        grid_spec=pltpu.PrefetchScalarGridSpec(
            num_scalar_prefetch=0,
            grid=(B,),
            in_specs=[x_spec, smem_spec, smem_spec, smem_spec, smem_spec, smem_spec],
            out_specs=o_spec,
        ),
        compiler_params=pltpu.CompilerParams(
            dimension_semantics=("parallel",), **extra),
        cost_estimate=pl.CostEstimate(
            flops=flops, transcendentals=transcendentals,
            bytes_accessed=bytes_accessed),
    )(x4, *w_flat)

    out = out.reshape(B, C1, HWp)
    if padded:
        out = out[:, :, :HW]
    return out.reshape(B, C1, H, W)


# -------------------------- pure-JAX reference ------------------------------

def _conv1x1_ref(w, x):
    # w: (co, ci), x: (B, ci, n) -> (B, co, n); same arithmetic order as kernel.
    co, ci = w.shape
    out = w[None, :, 0:1] * x[:, 0:1, :]
    for c in range(1, ci):
        out = out + w[None, :, c:c + 1] * x[:, c:c + 1, :]
    return out


def _softmax_ref(s):
    m = jnp.max(s, axis=-1, keepdims=True)
    e = jnp.exp(s - m)
    return e / jnp.sum(e, axis=-1, keepdims=True)


def psap_ref(x, wqr, wvr, wup, wql, wvl):
    B, C1, H, W = x.shape
    HW = H * W
    x0 = x.reshape(B, C1, HW).astype(jnp.float32)

    # spatial_pool
    input_x = _conv1x1_ref(wvr, x0)
    cmask = _softmax_ref(_conv1x1_ref(wqr, x0))
    context = jnp.sum(input_x * cmask, axis=-1, keepdims=True)      # (B, ch, 1)
    ctx_s = 1.0 / (1.0 + jnp.exp(-_conv1x1_ref(wup, context)))      # (B, C2, 1)
    x1 = x0 * ctx_s

    # channel_pool (on the mutated x, matching PyTorch in-place execution)
    g_x = _conv1x1_ref(wql, x1)
    avg_x = jnp.sum(g_x, axis=-1, keepdims=True) * (1.0 / HW)       # (B, ch, 1)
    theta_x = _conv1x1_ref(wvl, x1)
    ctx_c = jnp.sum(avg_x * theta_x, axis=1, keepdims=True)         # (B, 1, HW)
    ctx_c = 1.0 / (1.0 + jnp.exp(-_softmax_ref(ctx_c)))
    x2 = x1 * ctx_c

    return (x2 + x2).reshape(B, C1, H, W).astype(x.dtype)


# ------------------------------- main ---------------------------------------

if __name__ == "__main__":
    key = jax.random.PRNGKey(0)
    B, C1, C2, H, W = 2, 4, 4, 16, 16
    ch = C2 // 2

    k = jax.random.split(key, 6)
    x = jax.random.normal(k[0], (B, C1, H, W), dtype=jnp.float32)
    sc = 1.0 / math.sqrt(C1)
    wqr = jax.random.normal(k[1], (1, C1), jnp.float32) * sc              # conv_q_right
    wvr = jax.random.normal(k[2], (ch, C1), jnp.float32) * sc             # conv_v_right
    wup = jax.random.normal(k[3], (C2, ch), jnp.float32) / math.sqrt(ch)  # conv_up
    wql = jax.random.normal(k[4], (ch, C1), jnp.float32) * sc             # conv_q_left
    wvl = jax.random.normal(k[5], (ch, C1), jnp.float32) * sc             # conv_v_left

    y = psap_forward(x, wqr, wvr, wup, wql, wvl)
    jax.block_until_ready(y)

    y_ref = psap_ref(x, wqr, wvr, wup, wql, wvl)
    assert y.shape == x.shape and y.dtype == x.dtype
    err = float(jnp.max(jnp.abs(y - y_ref)))
    # 1e-4: kernel computes the channel sigmoid as 1 + tanh(s/2) on the EUP;
    # everything else is bit-comparable f32 arithmetic.
    assert jnp.allclose(y, y_ref, atol=1e-4, rtol=1e-4), f"max abs err = {err}"
    print("KERNEL_OK")
</pallas_src>

<mosaic_0001>
module attributes {stable_mosaic.version = 11 : i64} {
  func.func @kernel(%arg0: i32, %arg1: memref<1x4x2x128xf32, #tpu.memory_space<vmem>>, %arg2: memref<4xf32, #tpu.memory_space<smem>>, %arg3: memref<8xf32, #tpu.memory_space<smem>>, %arg4: memref<8xf32, #tpu.memory_space<smem>>, %arg5: memref<8xf32, #tpu.memory_space<smem>>, %arg6: memref<8xf32, #tpu.memory_space<smem>>, %arg7: memref<1x4x2x128xf32, #tpu.memory_space<vmem>>) attributes {dimension_semantics = [#tpu.dimension_semantics<parallel>], iteration_bounds = array<i64: 2>, scalar_prefetch = 0 : i64, scratch_operands = 0 : i64, tpu.core_type = #tpu.core_type<tc>, window_params = [{transform_indices = @transform_0, window_bounds = array<i64: 1, 4, 2, 128>}, {transform_indices = @transform_1, window_bounds = array<i64: 4>}, {transform_indices = @transform_2, window_bounds = array<i64: 8>}, {transform_indices = @transform_3, window_bounds = array<i64: 8>}, {transform_indices = @transform_4, window_bounds = array<i64: 8>}, {transform_indices = @transform_5, window_bounds = array<i64: 8>}, {transform_indices = @transform_6, window_bounds = array<i64: 1, 4, 2, 128>}]} {
    %c0 = arith.constant 0 : index
    %c0_0 = arith.constant 0 : index
    %c0_1 = arith.constant 0 : index
    %c0_2 = arith.constant 0 : index
    %0 = vector.load %arg1[%c0, %c0_0, %c0_1, %c0_2] : memref<1x4x2x128xf32, #tpu.memory_space<vmem>>, vector<1x1x2x128xf32>
    %1 = vector.shape_cast %0 : vector<1x1x2x128xf32> to vector<2x128xf32>
    %c0_3 = arith.constant 0 : index
    %c1 = arith.constant 1 : index
    %c0_4 = arith.constant 0 : index
    %c0_5 = arith.constant 0 : index
    %2 = vector.load %arg1[%c0_3, %c1, %c0_4, %c0_5] : memref<1x4x2x128xf32, #tpu.memory_space<vmem>>, vector<1x1x2x128xf32>
    %3 = vector.shape_cast %2 : vector<1x1x2x128xf32> to vector<2x128xf32>
    %c0_6 = arith.constant 0 : index
    %c2 = arith.constant 2 : index
    %c0_7 = arith.constant 0 : index
    %c0_8 = arith.constant 0 : index
    %4 = vector.load %arg1[%c0_6, %c2, %c0_7, %c0_8] : memref<1x4x2x128xf32, #tpu.memory_space<vmem>>, vector<1x1x2x128xf32>
    %5 = vector.shape_cast %4 : vector<1x1x2x128xf32> to vector<2x128xf32>
    %c0_9 = arith.constant 0 : index
    %c3 = arith.constant 3 : index
    %c0_10 = arith.constant 0 : index
    %c0_11 = arith.constant 0 : index
    %6 = vector.load %arg1[%c0_9, %c3, %c0_10, %c0_11] : memref<1x4x2x128xf32, #tpu.memory_space<vmem>>, vector<1x1x2x128xf32>
    %7 = vector.shape_cast %6 : vector<1x1x2x128xf32> to vector<2x128xf32>
    %c0_12 = arith.constant 0 : index
    %8 = memref.load %arg3[%c0_12] : memref<8xf32, #tpu.memory_space<smem>>
    %9 = vector.broadcast %8 : f32 to vector<2x128xf32>
    %10 = arith.mulf %1, %9 : vector<2x128xf32>
    %c1_13 = arith.constant 1 : index
    %11 = memref.load %arg3[%c1_13] : memref<8xf32, #tpu.memory_space<smem>>
    %12 = vector.broadcast %11 : f32 to vector<2x128xf32>
    %13 = arith.mulf %3, %12 : vector<2x128xf32>
    %14 = arith.addf %10, %13 : vector<2x128xf32>
    %c2_14 = arith.constant 2 : index
    %15 = memref.load %arg3[%c2_14] : memref<8xf32, #tpu.memory_space<smem>>
    %16 = vector.broadcast %15 : f32 to vector<2x128xf32>
    %17 = arith.mulf %5, %16 : vector<2x128xf32>
    %18 = arith.addf %14, %17 : vector<2x128xf32>
    %c3_15 = arith.constant 3 : index
    %19 = memref.load %arg3[%c3_15] : memref<8xf32, #tpu.memory_space<smem>>
    %20 = vector.broadcast %19 : f32 to vector<2x128xf32>
    %21 = arith.mulf %7, %20 : vector<2x128xf32>
    %22 = arith.addf %18, %21 : vector<2x128xf32>
    %c4 = arith.constant 4 : index
    %23 = memref.load %arg3[%c4] : memref<8xf32, #tpu.memory_space<smem>>
    %24 = vector.broadcast %23 : f32 to vector<2x128xf32>
    %25 = arith.mulf %1, %24 : vector<2x128xf32>
    %c5 = arith.constant 5 : index
    %26 = memref.load %arg3[%c5] : memref<8xf32, #tpu.memory_space<smem>>
    %27 = vector.broadcast %26 : f32 to vector<2x128xf32>
    %28 = arith.mulf %3, %27 : vector<2x128xf32>
    %29 = arith.addf %25, %28 : vector<2x128xf32>
    %c6 = arith.constant 6 : index
    %30 = memref.load %arg3[%c6] : memref<8xf32, #tpu.memory_space<smem>>
    %31 = vector.broadcast %30 : f32 to vector<2x128xf32>
    %32 = arith.mulf %5, %31 : vector<2x128xf32>
    %33 = arith.addf %29, %32 : vector<2x128xf32>
    %c7 = arith.constant 7 : index
    %34 = memref.load %arg3[%c7] : memref<8xf32, #tpu.memory_space<smem>>
    %35 = vector.broadcast %34 : f32 to vector<2x128xf32>
    %36 = arith.mulf %7, %35 : vector<2x128xf32>
    %37 = arith.addf %33, %36 : vector<2x128xf32>
    %c0_16 = arith.constant 0 : index
    %38 = memref.load %arg2[%c0_16] : memref<4xf32, #tpu.memory_space<smem>>
    %39 = vector.broadcast %38 : f32 to vector<2x128xf32>
    %40 = arith.mulf %1, %39 : vector<2x128xf32>
    %c1_17 = arith.constant 1 : index
    %41 = memref.load %arg2[%c1_17] : memref<4xf32, #tpu.memory_space<smem>>
    %42 = vector.broadcast %41 : f32 to vector<2x128xf32>
    %43 = arith.mulf %3, %42 : vector<2x128xf32>
    %44 = arith.addf %40, %43 : vector<2x128xf32>
    %c2_18 = arith.constant 2 : index
    %45 = memref.load %arg2[%c2_18] : memref<4xf32, #tpu.memory_space<smem>>
    %46 = vector.broadcast %45 : f32 to vector<2x128xf32>
    %47 = arith.mulf %5, %46 : vector<2x128xf32>
    %48 = arith.addf %44, %47 : vector<2x128xf32>
    %c3_19 = arith.constant 3 : index
    %49 = memref.load %arg2[%c3_19] : memref<4xf32, #tpu.memory_space<smem>>
    %50 = vector.broadcast %49 : f32 to vector<2x128xf32>
    %51 = arith.mulf %7, %50 : vector<2x128xf32>
    %52 = arith.addf %48, %51 : vector<2x128xf32>
    %cst = arith.constant dense<0xFF800000> : vector<2xf32>
    %53 = vector.multi_reduction <maximumf>, %52, %cst [1] : vector<2x128xf32> to vector<2xf32>
    %54 = vector.shape_cast %53 : vector<2xf32> to vector<2x1xf32>
    %cst_20 = arith.constant dense<0xFF800000> : vector<1xf32>
    %55 = vector.multi_reduction <maximumf>, %54, %cst_20 [0] : vector<2x1xf32> to vector<1xf32>
    %56 = vector.shape_cast %55 : vector<1xf32> to vector<1x1xf32>
    %57 = vector.broadcast %56 : vector<1x1xf32> to vector<2x128xf32>
    %58 = arith.subf %52, %57 : vector<2x128xf32>
    %59 = math.exp %58 : vector<2x128xf32>
    %cst_21 = arith.constant dense<0.000000e+00> : vector<2xf32>
    %60 = vector.multi_reduction <add>, %59, %cst_21 [1] : vector<2x128xf32> to vector<2xf32>
    %61 = vector.shape_cast %60 : vector<2xf32> to vector<2x1xf32>
    %cst_22 = arith.constant dense<0.000000e+00> : vector<1xf32>
    %62 = vector.multi_reduction <add>, %61, %cst_22 [0] : vector<2x1xf32> to vector<1xf32>
    %63 = vector.shape_cast %62 : vector<1xf32> to vector<1x1xf32>
    %cst_23 = arith.constant 1.000000e+00 : f32
    %64 = vector.broadcast %cst_23 : f32 to vector<1x1xf32>
    %65 = arith.divf %64, %63 : vector<1x1xf32>
    %66 = vector.broadcast %65 : vector<1x1xf32> to vector<2x128xf32>
    %67 = arith.mulf %59, %66 : vector<2x128xf32>
    %68 = arith.mulf %22, %67 : vector<2x128xf32>
    %cst_24 = arith.constant dense<0.000000e+00> : vector<2xf32>
    %69 = vector.multi_reduction <add>, %68, %cst_24 [1] : vector<2x128xf32> to vector<2xf32>
    %70 = vector.shape_cast %69 : vector<2xf32> to vector<2x1xf32>
    %cst_25 = arith.constant dense<0.000000e+00> : vector<1xf32>
    %71 = vector.multi_reduction <add>, %70, %cst_25 [0] : vector<2x1xf32> to vector<1xf32>
    %72 = vector.shape_cast %71 : vector<1xf32> to vector<1x1xf32>
    %73 = arith.mulf %37, %67 : vector<2x128xf32>
    %cst_26 = arith.constant dense<0.000000e+00> : vector<2xf32>
    %74 = vector.multi_reduction <add>, %73, %cst_26 [1] : vector<2x128xf32> to vector<2xf32>
    %75 = vector.shape_cast %74 : vector<2xf32> to vector<2x1xf32>
    %cst_27 = arith.constant dense<0.000000e+00> : vector<1xf32>
    %76 = vector.multi_reduction <add>, %75, %cst_27 [0] : vector<2x1xf32> to vector<1xf32>
    %77 = vector.shape_cast %76 : vector<1xf32> to vector<1x1xf32>
    %c0_28 = arith.constant 0 : index
    %78 = memref.load %arg4[%c0_28] : memref<8xf32, #tpu.memory_space<smem>>
    %79 = vector.broadcast %78 : f32 to vector<1x1xf32>
    %80 = arith.mulf %72, %79 : vector<1x1xf32>
    %c1_29 = arith.constant 1 : index
    %81 = memref.load %arg4[%c1_29] : memref<8xf32, #tpu.memory_space<smem>>
    %82 = vector.broadcast %81 : f32 to vector<1x1xf32>
    %83 = arith.mulf %77, %82 : vector<1x1xf32>
    %84 = arith.addf %80, %83 : vector<1x1xf32>
    %cst_30 = arith.constant 0.000000e+00 : f32
    %85 = vector.broadcast %cst_30 : f32 to vector<1x1xf32>
    %86 = arith.subf %85, %84 : vector<1x1xf32>
    %87 = math.exp %86 : vector<1x1xf32>
    %cst_31 = arith.constant 1.000000e+00 : f32
    %88 = vector.broadcast %cst_31 : f32 to vector<1x1xf32>
    %89 = arith.addf %88, %87 : vector<1x1xf32>
    %cst_32 = arith.constant 1.000000e+00 : f32
    %90 = vector.broadcast %cst_32 : f32 to vector<1x1xf32>
    %91 = arith.divf %90, %89 : vector<1x1xf32>
    %c2_33 = arith.constant 2 : index
    %92 = memref.load %arg4[%c2_33] : memref<8xf32, #tpu.memory_space<smem>>
    %93 = vector.broadcast %92 : f32 to vector<1x1xf32>
    %94 = arith.mulf %72, %93 : vector<1x1xf32>
    %c3_34 = arith.constant 3 : index
    %95 = memref.load %arg4[%c3_34] : memref<8xf32, #tpu.memory_space<smem>>
    %96 = vector.broadcast %95 : f32 to vector<1x1xf32>
    %97 = arith.mulf %77, %96 : vector<1x1xf32>
    %98 = arith.addf %94, %97 : vector<1x1xf32>
    %cst_35 = arith.constant 0.000000e+00 : f32
    %99 = vector.broadcast %cst_35 : f32 to vector<1x1xf32>
    %100 = arith.subf %99, %98 : vector<1x1xf32>
    %101 = math.exp %100 : vector<1x1xf32>
    %cst_36 = arith.constant 1.000000e+00 : f32
    %102 = vector.broadcast %cst_36 : f32 to vector<1x1xf32>
    %103 = arith.addf %102, %101 : vector<1x1xf32>
    %cst_37 = arith.constant 1.000000e+00 : f32
    %104 = vector.broadcast %cst_37 : f32 to vector<1x1xf32>
    %105 = arith.divf %104, %103 : vector<1x1xf32>
    %c4_38 = arith.constant 4 : index
    %106 = memref.load %arg4[%c4_38] : memref<8xf32, #tpu.memory_space<smem>>
    %107 = vector.broadcast %106 : f32 to vector<1x1xf32>
    %108 = arith.mulf %72, %107 : vector<1x1xf32>
    %c5_39 = arith.constant 5 : index
    %109 = memref.load %arg4[%c5_39] : memref<8xf32, #tpu.memory_space<smem>>
    %110 = vector.broadcast %109 : f32 to vector<1x1xf32>
    %111 = arith.mulf %77, %110 : vector<1x1xf32>
    %112 = arith.addf %108, %111 : vector<1x1xf32>
    %cst_40 = arith.constant 0.000000e+00 : f32
    %113 = vector.broadcast %cst_40 : f32 to vector<1x1xf32>
    %114 = arith.subf %113, %112 : vector<1x1xf32>
    %115 = math.exp %114 : vector<1x1xf32>
    %cst_41 = arith.constant 1.000000e+00 : f32
    %116 = vector.broadcast %cst_41 : f32 to vector<1x1xf32>
    %117 = arith.addf %116, %115 : vector<1x1xf32>
    %cst_42 = arith.constant 1.000000e+00 : f32
    %118 = vector.broadcast %cst_42 : f32 to vector<1x1xf32>
    %119 = arith.divf %118, %117 : vector<1x1xf32>
    %c6_43 = arith.constant 6 : index
    %120 = memref.load %arg4[%c6_43] : memref<8xf32, #tpu.memory_space<smem>>
    %121 = vector.broadcast %120 : f32 to vector<1x1xf32>
    %122 = arith.mulf %72, %121 : vector<1x1xf32>
    %c7_44 = arith.constant 7 : index
    %123 = memref.load %arg4[%c7_44] : memref<8xf32, #tpu.memory_space<smem>>
    %124 = vector.broadcast %123 : f32 to vector<1x1xf32>
    %125 = arith.mulf %77, %124 : vector<1x1xf32>
    %126 = arith.addf %122, %125 : vector<1x1xf32>
    %cst_45 = arith.constant 0.000000e+00 : f32
    %127 = vector.broadcast %cst_45 : f32 to vector<1x1xf32>
    %128 = arith.subf %127, %126 : vector<1x1xf32>
    %129 = math.exp %128 : vector<1x1xf32>
    %cst_46 = arith.constant 1.000000e+00 : f32
    %130 = vector.broadcast %cst_46 : f32 to vector<1x1xf32>
    %131 = arith.addf %130, %129 : vector<1x1xf32>
    %cst_47 = arith.constant 1.000000e+00 : f32
    %132 = vector.broadcast %cst_47 : f32 to vector<1x1xf32>
    %133 = arith.divf %132, %131 : vector<1x1xf32>
    %134 = vector.broadcast %91 : vector<1x1xf32> to vector<2x128xf32>
    %135 = arith.mulf %1, %134 : vector<2x128xf32>
    %136 = vector.broadcast %105 : vector<1x1xf32> to vector<2x128xf32>
    %137 = arith.mulf %3, %136 : vector<2x128xf32>
    %138 = vector.broadcast %119 : vector<1x1xf32> to vector<2x128xf32>
    %139 = arith.mulf %5, %138 : vector<2x128xf32>
    %140 = vector.broadcast %133 : vector<1x1xf32> to vector<2x128xf32>
    %141 = arith.mulf %7, %140 : vector<2x128xf32>
    %c0_48 = arith.constant 0 : index
    %142 = memref.load %arg5[%c0_48] : memref<8xf32, #tpu.memory_space<smem>>
    %143 = vector.broadcast %142 : f32 to vector<2x128xf32>
    %144 = arith.mulf %135, %143 : vector<2x128xf32>
    %c1_49 = arith.constant 1 : index
    %145 = memref.load %arg5[%c1_49] : memref<8xf32, #tpu.memory_space<smem>>
    %146 = vector.broadcast %145 : f32 to vector<2x128xf32>
    %147 = arith.mulf %137, %146 : vector<2x128xf32>
    %148 = arith.addf %144, %147 : vector<2x128xf32>
    %c2_50 = arith.constant 2 : index
    %149 = memref.load %arg5[%c2_50] : memref<8xf32, #tpu.memory_space<smem>>
    %150 = vector.broadcast %149 : f32 to vector<2x128xf32>
    %151 = arith.mulf %139, %150 : vector<2x128xf32>
    %152 = arith.addf %148, %151 : vector<2x128xf32>
    %c3_51 = arith.constant 3 : index
    %153 = memref.load %arg5[%c3_51] : memref<8xf32, #tpu.memory_space<smem>>
    %154 = vector.broadcast %153 : f32 to vector<2x128xf32>
    %155 = arith.mulf %141, %154 : vector<2x128xf32>
    %156 = arith.addf %152, %155 : vector<2x128xf32>
    %c4_52 = arith.constant 4 : index
    %157 = memref.load %arg5[%c4_52] : memref<8xf32, #tpu.memory_space<smem>>
    %158 = vector.broadcast %157 : f32 to vector<2x128xf32>
    %159 = arith.mulf %135, %158 : vector<2x128xf32>
    %c5_53 = arith.constant 5 : index
    %160 = memref.load %arg5[%c5_53] : memref<8xf32, #tpu.memory_space<smem>>
    %161 = vector.broadcast %160 : f32 to vector<2x128xf32>
    %162 = arith.mulf %137, %161 : vector<2x128xf32>
    %163 = arith.addf %159, %162 : vector<2x128xf32>
    %c6_54 = arith.constant 6 : index
    %164 = memref.load %arg5[%c6_54] : memref<8xf32, #tpu.memory_space<smem>>
    %165 = vector.broadcast %164 : f32 to vector<2x128xf32>
    %166 = arith.mulf %139, %165 : vector<2x128xf32>
    %167 = arith.addf %163, %166 : vector<2x128xf32>
    %c7_55 = arith.constant 7 : index
    %168 = memref.load %arg5[%c7_55] : memref<8xf32, #tpu.memory_space<smem>>
    %169 = vector.broadcast %168 : f32 to vector<2x128xf32>
    %170 = arith.mulf %141, %169 : vector<2x128xf32>
    %171 = arith.addf %167, %170 : vector<2x128xf32>
    %c0_56 = arith.constant 0 : index
    %172 = memref.load %arg6[%c0_56] : memref<8xf32, #tpu.memory_space<smem>>
    %173 = vector.broadcast %172 : f32 to vector<2x128xf32>
    %174 = arith.mulf %135, %173 : vector<2x128xf32>
    %c1_57 = arith.constant 1 : index
    %175 = memref.load %arg6[%c1_57] : memref<8xf32, #tpu.memory_space<smem>>
    %176 = vector.broadcast %175 : f32 to vector<2x128xf32>
    %177 = arith.mulf %137, %176 : vector<2x128xf32>
    %178 = arith.addf %174, %177 : vector<2x128xf32>
    %c2_58 = arith.constant 2 : index
    %179 = memref.load %arg6[%c2_58] : memref<8xf32, #tpu.memory_space<smem>>
    %180 = vector.broadcast %179 : f32 to vector<2x128xf32>
    %181 = arith.mulf %139, %180 : vector<2x128xf32>
    %182 = arith.addf %178, %181 : vector<2x128xf32>
    %c3_59 = arith.constant 3 : index
    %183 = memref.load %arg6[%c3_59] : memref<8xf32, #tpu.memory_space<smem>>
    %184 = vector.broadcast %183 : f32 to vector<2x128xf32>
    %185 = arith.mulf %141, %184 : vector<2x128xf32>
    %186 = arith.addf %182, %185 : vector<2x128xf32>
    %c4_60 = arith.constant 4 : index
    %187 = memref.load %arg6[%c4_60] : memref<8xf32, #tpu.memory_space<smem>>
    %188 = vector.broadcast %187 : f32 to vector<2x128xf32>
    %189 = arith.mulf %135, %188 : vector<2x128xf32>
    %c5_61 = arith.constant 5 : index
    %190 = memref.load %arg6[%c5_61] : memref<8xf32, #tpu.memory_space<smem>>
    %191 = vector.broadcast %190 : f32 to vector<2x128xf32>
    %192 = arith.mulf %137, %191 : vector<2x128xf32>
    %193 = arith.addf %189, %192 : vector<2x128xf32>
    %c6_62 = arith.constant 6 : index
    %194 = memref.load %arg6[%c6_62] : memref<8xf32, #tpu.memory_space<smem>>
    %195 = vector.broadcast %194 : f32 to vector<2x128xf32>
    %196 = arith.mulf %139, %195 : vector<2x128xf32>
    %197 = arith.addf %193, %196 : vector<2x128xf32>
    %c7_63 = arith.constant 7 : index
    %198 = memref.load %arg6[%c7_63] : memref<8xf32, #tpu.memory_space<smem>>
    %199 = vector.broadcast %198 : f32 to vector<2x128xf32>
    %200 = arith.mulf %141, %199 : vector<2x128xf32>
    %201 = arith.addf %197, %200 : vector<2x128xf32>
    %cst_64 = arith.constant dense<0.000000e+00> : vector<2xf32>
    %202 = vector.multi_reduction <add>, %156, %cst_64 [1] : vector<2x128xf32> to vector<2xf32>
    %203 = vector.shape_cast %202 : vector<2xf32> to vector<2x1xf32>
    %cst_65 = arith.constant dense<0.000000e+00> : vector<1xf32>
    %204 = vector.multi_reduction <add>, %203, %cst_65 [0] : vector<2x1xf32> to vector<1xf32>
    %205 = vector.shape_cast %204 : vector<1xf32> to vector<1x1xf32>
    %cst_66 = arith.constant 3.906250e-03 : f32
    %206 = vector.broadcast %cst_66 : f32 to vector<1x1xf32>
    %207 = arith.mulf %205, %206 : vector<1x1xf32>
    %208 = vector.broadcast %207 : vector<1x1xf32> to vector<2x128xf32>
    %209 = arith.mulf %208, %186 : vector<2x128xf32>
    %cst_67 = arith.constant dense<0.000000e+00> : vector<2xf32>
    %210 = vector.multi_reduction <add>, %171, %cst_67 [1] : vector<2x128xf32> to vector<2xf32>
    %211 = vector.shape_cast %210 : vector<2xf32> to vector<2x1xf32>
    %cst_68 = arith.constant dense<0.000000e+00> : vector<1xf32>
    %212 = vector.multi_reduction <add>, %211, %cst_68 [0] : vector<2x1xf32> to vector<1xf32>
    %213 = vector.shape_cast %212 : vector<1xf32> to vector<1x1xf32>
    %cst_69 = arith.constant 3.906250e-03 : f32
    %214 = vector.broadcast %cst_69 : f32 to vector<1x1xf32>
    %215 = arith.mulf %213, %214 : vector<1x1xf32>
    %216 = vector.broadcast %215 : vector<1x1xf32> to vector<2x128xf32>
    %217 = arith.mulf %216, %201 : vector<2x128xf32>
    %218 = arith.addf %209, %217 : vector<2x128xf32>
    %cst_70 = arith.constant dense<0xFF800000> : vector<2xf32>
    %219 = vector.multi_reduction <maximumf>, %218, %cst_70 [1] : vector<2x128xf32> to vector<2xf32>
    %220 = vector.shape_cast %219 : vector<2xf32> to vector<2x1xf32>
    %cst_71 = arith.constant dense<0xFF800000> : vector<1xf32>
    %221 = vector.multi_reduction <maximumf>, %220, %cst_71 [0] : vector<2x1xf32> to vector<1xf32>
    %222 = vector.shape_cast %221 : vector<1xf32> to vector<1x1xf32>
    %223 = vector.broadcast %222 : vector<1x1xf32> to vector<2x128xf32>
    %224 = arith.subf %218, %223 : vector<2x128xf32>
    %225 = math.exp %224 : vector<2x128xf32>
    %cst_72 = arith.constant dense<0.000000e+00> : vector<2xf32>
    %226 = vector.multi_reduction <add>, %225, %cst_72 [1] : vector<2x128xf32> to vector<2xf32>
    %227 = vector.shape_cast %226 : vector<2xf32> to vector<2x1xf32>
    %cst_73 = arith.constant dense<0.000000e+00> : vector<1xf32>
    %228 = vector.multi_reduction <add>, %227, %cst_73 [0] : vector<2x1xf32> to vector<1xf32>
    %229 = vector.shape_cast %228 : vector<1xf32> to vector<1x1xf32>
    %cst_74 = arith.constant 1.000000e+00 : f32
    %230 = vector.broadcast %cst_74 : f32 to vector<1x1xf32>
    %231 = arith.divf %230, %229 : vector<1x1xf32>
    %232 = vector.broadcast %231 : vector<1x1xf32> to vector<2x128xf32>
    %233 = arith.mulf %225, %232 : vector<2x128xf32>
    %cst_75 = arith.constant 5.000000e-01 : f32
    %234 = vector.broadcast %cst_75 : f32 to vector<2x128xf32>
    %235 = arith.mulf %234, %233 : vector<2x128xf32>
    %236 = math.tanh %235 : vector<2x128xf32>
    %cst_76 = arith.constant 1.000000e+00 : f32
    %237 = vector.broadcast %cst_76 : f32 to vector<2x128xf32>
    %238 = arith.addf %237, %236 : vector<2x128xf32>
    %239 = arith.mulf %135, %238 : vector<2x128xf32>
    %c0_77 = arith.constant 0 : index
    %c0_78 = arith.constant 0 : index
    %c0_79 = arith.constant 0 : index
    %c0_80 = arith.constant 0 : index
    %240 = vector.load %arg7[%c0_77, %c0_78, %c0_79, %c0_80] : memref<1x4x2x128xf32, #tpu.memory_space<vmem>>, vector<1x1x2x128xf32>
    %241 = vector.shape_cast %240 : vector<1x1x2x128xf32> to vector<2x128xf32>
    %242 = vector.shape_cast %239 : vector<2x128xf32> to vector<1x1x2x128xf32>
    tpu.vector_store %arg7[%c0_77, %c0_78, %c0_79, %c0_80], %242 {strides = array<i32>} : memref<1x4x2x128xf32, #tpu.memory_space<vmem>>, vector<1x1x2x128xf32>,
    %243 = arith.mulf %137, %238 : vector<2x128xf32>
    %c0_81 = arith.constant 0 : index
    %c1_82 = arith.constant 1 : index
    %c0_83 = arith.constant 0 : index
    %c0_84 = arith.constant 0 : index
    %244 = vector.load %arg7[%c0_81, %c1_82, %c0_83, %c0_84] : memref<1x4x2x128xf32, #tpu.memory_space<vmem>>, vector<1x1x2x128xf32>
    %245 = vector.shape_cast %244 : vector<1x1x2x128xf32> to vector<2x128xf32>
    %246 = vector.shape_cast %243 : vector<2x128xf32> to vector<1x1x2x128xf32>
    tpu.vector_store %arg7[%c0_81, %c1_82, %c0_83, %c0_84], %246 {strides = array<i32>} : memref<1x4x2x128xf32, #tpu.memory_space<vmem>>, vector<1x1x2x128xf32>,
    %247 = arith.mulf %139, %238 : vector<2x128xf32>
    %c0_85 = arith.constant 0 : index
    %c2_86 = arith.constant 2 : index
    %c0_87 = arith.constant 0 : index
    %c0_88 = arith.constant 0 : index
    %248 = vector.load %arg7[%c0_85, %c2_86, %c0_87, %c0_88] : memref<1x4x2x128xf32, #tpu.memory_space<vmem>>, vector<1x1x2x128xf32>
    %249 = vector.shape_cast %248 : vector<1x1x2x128xf32> to vector<2x128xf32>
    %250 = vector.shape_cast %247 : vector<2x128xf32> to vector<1x1x2x128xf32>
    tpu.vector_store %arg7[%c0_85, %c2_86, %c0_87, %c0_88], %250 {strides = array<i32>} : memref<1x4x2x128xf32, #tpu.memory_space<vmem>>, vector<1x1x2x128xf32>,
    %251 = arith.mulf %141, %238 : vector<2x128xf32>
    %c0_89 = arith.constant 0 : index
    %c3_90 = arith.constant 3 : index
    %c0_91 = arith.constant 0 : index
    %c0_92 = arith.constant 0 : index
    %252 = vector.load %arg7[%c0_89, %c3_90, %c0_91, %c0_92] : memref<1x4x2x128xf32, #tpu.memory_space<vmem>>, vector<1x1x2x128xf32>
    %253 = vector.shape_cast %252 : vector<1x1x2x128xf32> to vector<2x128xf32>
    %254 = vector.shape_cast %251 : vector<2x128xf32> to vector<1x1x2x128xf32>
    tpu.vector_store %arg7[%c0_89, %c3_90, %c0_91, %c0_92], %254 {strides = array<i32>} : memref<1x4x2x128xf32, #tpu.memory_space<vmem>>, vector<1x1x2x128xf32>,
    return
  }
  func.func @transform_0(%arg0: i32) -> (i32, i32, i32, i32) {
    %c0_i32 = arith.constant 0 : i32
    %c0_i32_0 = arith.constant 0 : i32
    %c0_i32_1 = arith.constant 0 : i32
    %c0_i32_2 = arith.constant 0 : i32
    return %arg0, %c0_i32, %c0_i32_0, %c0_i32_1 : i32, i32, i32, i32
  }
  func.func @transform_1(%arg0: i32) -> i32 {
    %c0_i32 = arith.constant 0 : i32
    %c0_i32_0 = arith.constant 0 : i32
    return %c0_i32 : i32
  }
  func.func @transform_2(%arg0: i32) -> i32 {
    %c0_i32 = arith.constant 0 : i32
    %c0_i32_0 = arith.constant 0 : i32
    return %c0_i32 : i32
  }
  func.func @transform_3(%arg0: i32) -> i32 {
    %c0_i32 = arith.constant 0 : i32
    %c0_i32_0 = arith.constant 0 : i32
    return %c0_i32 : i32
  }
  func.func @transform_4(%arg0: i32) -> i32 {
    %c0_i32 = arith.constant 0 : i32
    %c0_i32_0 = arith.constant 0 : i32
    return %c0_i32 : i32
  }
  func.func @transform_5(%arg0: i32) -> i32 {
    %c0_i32 = arith.constant 0 : i32
    %c0_i32_0 = arith.constant 0 : i32
    return %c0_i32 : i32
  }
  func.func @transform_6(%arg0: i32) -> (i32, i32, i32, i32) {
    %c0_i32 = arith.constant 0 : i32
    %c0_i32_0 = arith.constant 0 : i32
    %c0_i32_1 = arith.constant 0 : i32
    %c0_i32_2 = arith.constant 0 : i32
    return %arg0, %c0_i32, %c0_i32_0, %c0_i32_1 : i32, i32, i32, i32
  }
}

</mosaic_0001>

<bundles_post_ra>
// kernel: tpu_custom_call.1
= control target key start
LH: loop header
LB: loop body
LE: loop exit
PB: predicated region body
PF: predicated region fallthrough
CT: control target
= control target key end

     0   :  { %11 = vsyncpa [#allocation3], 0  ;;  %s1485_s0 = inlined_call_operand.hbm [shape: f32[2,4,2,128], index: 0, kind: input, shape index: {}]   ;;  %s1486_s1 = inlined_call_operand.vmem [shape: f32[4], index: 1, kind: input, shape index: {}]   ;;  %s1487_s2 = inlined_call_operand.vmem [shape: f32[8], index: 2, kind: input, shape index: {}]   ;;  %s1488_s3 = inlined_call_operand.vmem [shape: f32[8], index: 3, kind: input, shape index: {}]   ;;  %s1489_s4 = inlined_call_operand.vmem [shape: f32[8], index: 4, kind: input, shape index: {}]   ;;  %s1490_s5 = inlined_call_operand.vmem [shape: f32[8], index: 5, kind: input, shape index: {}]   ;;  %s1491_s6 = inlined_call_operand.hbm [shape: f32[2,4,2,128], index: 6, kind: output, shape index: {}]  }
   0x1   :  { %13 = vsyncpa [#allocation3 + $0x1], 0 }
   0x2   :  { %14 = vsyncpa [#allocation5], 0 }
   0x3   :  { %15 = vsyncpa [#allocation8], 0 }
   0x4   :  { %16 = vsyncpa [#allocation11], 0 }
   0x5   :  { %17 = vsyncpa [#allocation4], 0 }
   0x6   :  { %19 = vsyncpa [#allocation4 + $0x1], 0  ;;  %s1174_s21 = smov 0   ;;  %s1176_s22 = smov 0  }
   0x7   :  { %s1178_s23 = smov 0   ;;  %s1180_s24 = smov 0  }
   0x8 LB: > { %s211_s27 = sshll.u32 %s1487_s2, 4  ;;  %s1198_s28 = sadd.s32 4294967295, %s1126_s24   ;;  %s1126_s24 = sphi %s1180_s24, %s1516_s24   ;;  %s1122_s23 = sphi %s1178_s23, %s1515_s23   ;;  %s1118_s22 = sphi %s1176_s22, %s1514_s22   ;;  %s1114_s21 = sphi %s1174_s21, %s1513_s21   ;;  %s212_s27 = int_to_ptr.vmem [resolvable:$true] %s211_s27 }
   0x9   : > { %p754_p0 = scmp.ge.s32.totalorder %s1126_s24, 1  ;;  %p1492_p1 = scmp.eq.s32.totalorder %s1198_s28, 0 }
   0xa   : > { %p187_p2 = scmp.lt.s32.totalorder %s1126_s24, 3  ;;  %s233_s8 = sshll.u32 %s1489_s4, 4  ;;  %s234_s8 = int_to_ptr.vmem [resolvable:$true] %s233_s8 }
   0xb   : > { %s200_s11 = sshll.u32 %s1486_s1, 4  ;;  %s222_s15 = sshll.u32 %s1488_s3, 4  ;;  %s1222_s11 = int_to_ptr.vmem [resolvable:$true] %s200_s11  ;;  %s1227_s15 = int_to_ptr.vmem [resolvable:$true] %s222_s15 }
   0xc   : > { %p1203_p3 = pnand %p754_p0, %p187_p2  ;;  %s943_s16 = scalar_lea.vmem %s212_s27, 16 }
   0xd   : > { %p944_p7 = scmp.ne.s32.totalorder %s212_s27, %s943_s16  ;;  %p951_p11 = scmp.lt.s32.totalorder %s212_s27, %s212_s27 }
   0xe   : > { %s1495_s29 = scalar_select %p1203_p3, 1, 0 }
   0xf   : > { %p840_p5 = pneg %p1203_p3  ;;  %p952_p12 = scmp.lt.s32.totalorder %s943_s16, %s943_s16 }
  0x11   : > { %p1218_p6 = pnand %p840_p5, %p1492_p1  ;;  %p953_p13 = por %p952_p12, %p951_p11 }
  0x13   : > { %p1231_p8 = pneg %p1218_p6 }
  0x15   : > { %p946_p9 = pnand %p1231_p8, %p944_p7 }
  0x17   : > { %p947_p10 = pneg %p946_p9 }
  0x19   : > { %p954_p0 = pnand %p953_p13, %p947_p10 }
  0x1b   : > { %957 = shalt.err (!%p954_p0)
}
  0x1c   : > { %s1128_s18 = smov [#allocation7]   ;;  %s958_s19 = scalar_lea.vmem %s234_s8, 16 }
  0x1d   : > { %846 = dma.vmem_to_smem (!%p1218_p6), %s212_s27, 16, %s1128_s18, [#allocation8]  }
  0x1e   : > { %p959_p2 = scmp.ne.s32.totalorder %s234_s8, %s958_s19  ;;  %p966_p1 = scmp.lt.s32.totalorder %s234_s8, %s234_s8 }
  0x1f   : > { %p967_p3 = scmp.lt.s32.totalorder %s958_s19, %s958_s19 }
  0x20   : > { %p961_p5 = pnand %p959_p2, %p1231_p8 }
  0x21   : > { %p968_p7 = por %p967_p3, %p966_p1 }
  0x22   : > { %p962_p4 = pneg %p961_p5 }
  0x24   : > { %p969_p9 = pnand %p968_p7, %p962_p4 }
  0x26   : > { %972 = shalt.err (!%p969_p9)
}
  0x27   : > { %s1129_s20 = smov [#allocation10]   ;;  %s973_s25 = scalar_lea.vmem %s1222_s11, 16 }
  0x28   : > { %852 = dma.vmem_to_smem (!%p1218_p6), %s234_s8, 16, %s1129_s20, [#allocation11]  }
  0x29   : > { %p974_p10 = scmp.ne.s32.totalorder %s1222_s11, %s973_s25  ;;  %p981_p13 = scmp.lt.s32.totalorder %s1222_s11, %s1222_s11 }
  0x2a   : > { %p982_p0 = scmp.lt.s32.totalorder %s973_s25, %s973_s25 }
  0x2b   : > { %p976_p11 = pnand %p974_p10, %p1231_p8 }
  0x2c   : > { %p983_p2 = por %p982_p0, %p981_p13 }
  0x2d   : > { %p977_p12 = pneg %p976_p11 }
  0x2f   : > { %p984_p1 = pnand %p983_p2, %p977_p12 }
  0x31   : > { %987 = shalt.err (!%p984_p1)
}
  0x32   : > { %s1130_s26 = smov [#allocation6]   ;;  %s988_s27 = scalar_lea.vmem %s1227_s15, 16 }
  0x33   : > { %843 = dma.vmem_to_smem (!%p1218_p6), %s1222_s11, 16, %s1130_s26, [#allocation5]  }
  0x34   : > { %p989_p3 = scmp.ne.s32.totalorder %s1227_s15, %s988_s27  ;;  %p996_p7 = scmp.lt.s32.totalorder %s1227_s15, %s1227_s15 }
  0x35   : > { %p997_p9 = scmp.lt.s32.totalorder %s988_s27, %s988_s27 }
  0x36   : > { %p991_p4 = pnand %p989_p3, %p1231_p8 }
  0x37   : > { %p998_p10 = por %p997_p9, %p996_p7 }
  0x38   : > { %p992_p5 = pneg %p991_p4 }
  0x3a   : > { %p999_p11 = pnand %p998_p10, %p992_p5 }
  0x3c   : > { %1002 = shalt.err (!%p999_p11)
}
  0x3d   : > { %s1131_s30 = smov [#allocation9]   ;;  %s244_s9 = sshll.u32 %s1490_s5, 4  ;;  %s245_s9 = int_to_ptr.vmem [resolvable:$true] %s244_s9 }
  0x3e   : > { %849 = dma.vmem_to_smem (!%p1218_p6), %s1227_s15, 16, %s1131_s30, [#allocation8]  }
  0x3f   : > { %s1003_s10 = scalar_lea.vmem %s245_s9, 16  ;;  %p1011_p2 = scmp.lt.s32.totalorder %s245_s9, %s245_s9 }
  0x40   : > { %p1004_p12 = scmp.ne.s32.totalorder %s245_s9, %s1003_s10  ;;  %p1012_p1 = scmp.lt.s32.totalorder %s1003_s10, %s1003_s10 }
  0x42   : > { %p1006_p13 = pnand %p1004_p12, %p1231_p8  ;;  %p1013_p3 = por %p1012_p1, %p1011_p2 }
  0x44   : > { %p1007_p0 = pneg %p1006_p13 }
  0x46   : > { %p1014_p4 = pnand %p1013_p3, %p1007_p0 }
  0x48   : > { %1017 = shalt.err (!%p1014_p4)
}
  0x49   : > { %s1132_s11 = smov [#allocation12]   ;;  %s753_s13 = sadd.s32 4294967294, %s1126_s24  }
  0x4a   : > { %855 = dma.vmem_to_smem (!%p1218_p6), %s245_s9, 16, %s1132_s11, [#allocation11]  }
  0x4b   : > { %s1270_s14 = sadd.s32 1, %s1126_s24   ;;  %s32_s12 = sadd.s32 1, %s1122_s23 }
  0x4c   : > { %s29_s15 = ssub.s32 %s1126_s24, %s1270_s14  ;;  %p39_p8 = scmp.ne.s32.totalorder %s1122_s23, %s1118_s22 }
  0x4d   : > { %p30_p5 = scmp.eq.s32.totalorder %s29_s15, 0  ;;  %p40_p7 = scmp.eq.s32.totalorder %s1126_s24, 0 }
  0x4e   : > { %p45_p9 = scmp.ne.s32.totalorder %s1118_s22, %s1114_s21  ;;  %p174_p10 = scmp.eq.s32.totalorder %s1198_s28, 1 }
  0x4f   : > { %s1282_s16 = scalar_select %p30_p5, %s1122_s23, %s32_s12  }
  0x50   : > { %p41_p11 = por %p40_p7, %p39_p8  ;;  %p1498_p12 = scmp.eq.s32.totalorder %s1198_s28, 0 }
  0x51   : > { %p1290_p6 = por %p174_p10, %p39_p8  ;;  %p180_p0 = scmp.eq.s32.totalorder %s753_s13, 1 }
  0x52   : > { %p1286_p13 = por %p1498_p12, %p45_p9  ;;  %p869_p2 = scmp.lt.s32.totalorder %s1126_s24, 2 }
  0x53   : > { %s1500_s18 = scalar_select %p1290_p6, 1, 0 }
  0x54   : > { %s255_s19 = sand.u32 1, %s1122_s23   ;;  %p1296_p1 = por %p180_p0, %p45_p9 }
  0x55   : > { %s761_s25 = sshll.u32 %s255_s19, 3  ;;  %s814_s26 = sshll.u32 %s1126_s24, 7 }
  0x56   : > { %s1501_s20 = scalar_select %p1296_p1, 1, 0 }
  0x57   : > { %s1304_s7 = scalar_lea.hbm %s1485_s0, %s814_s26  ;;  %s259_s8 = scalar_lea.vmem [#allocation2], %s761_s25 }
  0x58   : > { %s266_s9 = sshll.u32 %s259_s8, 4  ;;  %p1306_p3 = pnand %p869_p2, %p41_p11  ;;  %s1310_s9 = int_to_ptr.vmem [resolvable:$true] %s266_s9 }
  0x59   : > { %s1312_s11 = scalar_lea.sflag [#allocation3], %s255_s19  ;;  %s1018_s13 = scalar_lea.hbm %s1304_s7, 128 }
  0x5a   : > { %p1019_p4 = scmp.ne.s32.totalorder %s1304_s7, %s1018_s13  ;;  %p1020_p8 = pneg %p1306_p3 }
  0x5b   : > { %s1023_s25 = scalar_lea.hbm %s1485_s0, 256  ;;  %p1024_p9 = scmp.lt.u32.totalorder %s1304_s7, %s1485_s0 }
  0x5c   : > { %p1021_p5 = pnand %p1020_p8, %p1019_p4  ;;  %p1025_p10 = scmp.lt.u32.totalorder %s1023_s25, %s1018_s13 }
  0x5d   : > { %p1027_p12 = scmp.lt.u32.totalorder %s1018_s13, %s1304_s7 }
  0x5e   : > { %p1022_p7 = pneg %p1021_p5  ;;  %p1026_p11 = por %p1025_p10, %p1024_p9 }
  0x60   : > { %p1028_p0 = por %p1027_p12, %p1026_p11 }
  0x62   : > { %p1029_p2 = pnand %p1028_p0, %p1022_p7 }
  0x64   : > { %1032 = shalt.err (!%p1029_p2)
}
  0x65   : > { %s1033_s19 = scalar_lea.vmem %s1310_s9, 128  ;;  %s1133_s30 = smov [#allocation2]  }
  0x66   : > { %p1034_p4 = scmp.ne.s32.totalorder %s1310_s9, %s1033_s19  ;;  %s1038_s8 = sshll.u32 %s1133_s30, 4  ;;  %s1039_s8 = int_to_ptr.vmem [resolvable:$false] %s1038_s8 }
  0x67   : > { %s1040_s12 = scalar_lea.vmem %s1039_s8, 256  ;;  %p1041_p6 = scmp.lt.s32.totalorder %s1310_s9, %s1039_s8 }
  0x68   : > { %p1036_p5 = pnand %p1034_p4, %p1020_p8  ;;  %p1042_p9 = scmp.lt.s32.totalorder %s1040_s12, %s1033_s19 }
  0x6a   : > { %p1037_p1 = pneg %p1036_p5  ;;  %p1043_p10 = por %p1042_p9, %p1041_p6 }
  0x6c   : > { %p1044_p11 = pnand %p1043_p10, %p1037_p1 }
  0x6e   : > { %1047 = shalt.err (!%p1044_p11)
}
  0x6f   : > { %s1134_s13 = smov 32   ;;  %s1135_s15 = smov 2  }
  0x70   : > { %859 = dma.hbm_to_vmem [thread:$0]  (!%p1306_p3), %s1304_s7, 128, %s1310_s9, %s1312_s11, %s1134_s13, %s1134_s13, %s1135_s15  }
  0x71   : > { %p1503_p8 = scmp.ne.s32.totalorder %s1495_s29, 0 }
  0x72   : > { %s1343_s25 = sand.u32 (!%p1503_p8), 1, %s1118_s22  }
  0x73   : > { %278 = sbr.rel (%p1503_p8) target bundleno = 1230 (0x4ce), region = 44  ;;  %s765_s26 = sshll.u32 (!%p1503_p8), %s1343_s25, 3 }
  0x74   : > { %s281_s27 = scalar_lea.sflag (!%p1503_p8), [#allocation3], %s1343_s25  ;;  %s284_s19 = scalar_lea.vmem (!%p1503_p8), [#allocation2], %s765_s26 }
  0x7a   : > { %1093 = dma.done.wait (%p1286_p13), %s281_s27, 128  }
  0x7b   : > { %1095 = vsyncadd (%p1286_p13), %s281_s27, 4294967168  ;;  %p1504_p6 = scmp.eq.s32.totalorder %s1198_s28, 0 }
  0x7d   : > { %1097 = dma.done.wait (%p1504_p6), [#allocation5], 16   ;;  %p1505_p1 = pmov %p1504_p6 }
  0x7f   : > { %1099 = vsyncadd (%p1505_p1), [#allocation5], 4294967280  ;;  %p1506_p3 = pmov %p1505_p1 }
  0x80   : > { %p1507_p7 = pmov %p1505_p1 }
  0x81   : > { %1101 = dma.done.wait (%p1506_p3), [#allocation8], 32  }
  0x82   : > { %1103 = vsyncadd (%p1507_p7), [#allocation8], 4294967264  ;;  %p1508_p12 = pmov %p1505_p1 }
  0x83   : > { %p1509_p0 = pmov %p1505_p1 }
  0x84   : > { %1105 = dma.done.wait (%p1508_p12), [#allocation11], 32  }
  0x85   : > { %1107 = vsyncadd (%p1509_p0), [#allocation11], 4294967264 }
  0x86   : > { %309 = sfence }
  0x87   : > { %s371_s29 = sld [smem:[#allocation6]]  ;;  %s782_s17 = sld [smem:[#allocation6 + $0x1]]  ;;  %v1365_v0 = vld [vmem:[%s284_s19] sm:$0x3]  ;;  %v1367_v1 = vld [vmem:[%s284_s19 + $0x2] sm:$0x3] }
  0x88   : > { %s783_s7 = sld [smem:[#allocation6 + $0x2]]  ;;  %s784_s9 = sld [smem:[#allocation6 + $0x3]]  ;;  %v1369_v2 = vld [vmem:[%s284_s19 + $0x4] sm:$0x3]  ;;  %v1371_v3 = vld [vmem:[%s284_s19 + $0x6] sm:$0x3] }
  0x89   : > { %vm386_vm0 = vcmask 1041408   ;;  %s341_s10 = sld [smem:[#allocation7]]  ;;  %s775_s11 = sld [smem:[#allocation7 + $0x1]] }
  0x8a   : > { %s778_s30 = sld [smem:[#allocation7 + $0x4]]  ;;  %s779_s8 = sld [smem:[#allocation7 + $0x5]] }
  0x8b   : > { %s776_s12 = sld [smem:[#allocation7 + $0x2]]  ;;  %s780_s13 = sld [smem:[#allocation7 + $0x6]] }
  0x8c   : > { %s777_s15 = sld [smem:[#allocation7 + $0x3]]  ;;  %s781_s27 = sld [smem:[#allocation7 + $0x7]] }
  0x8d   : > { %v372_v4 = vstv %s371_s29  ;;  %v375_v5 = vstv %s782_s17  ;;  %s435_s19 = sld [smem:[#allocation9]]  ;;  %s786_s29 = sld [smem:[#allocation9 + $0x2]] }
  0x8e   : > { %v373_v6 = vmul.f32 %v372_v4, %v1365_v0  ;;  %v376_v7 = vmul.f32 %v1367_v1, %v375_v5  ;;  %v379_v8 = vstv %s783_s7  ;;  %v383_v9 = vstv %s784_s9  ;;  %s788_s17 = sld [smem:[#allocation9 + $0x4]]  ;;  %s790_s7 = sld [smem:[#allocation9 + $0x6]] }
  0x8f   : > { %v380_v10 = vmul.f32 %v1369_v2, %v379_v8  ;;  %v384_v12 = vmul.f32 %v1371_v3, %v383_v9  ;;  %v342_v34 = vstv %s341_s10  ;;  %v345_v35 = vstv %s775_s11  ;;  %s785_s9 = sld [smem:[#allocation9 + $0x1]]  ;;  %s787_s10 = sld [smem:[#allocation9 + $0x3]] }
  0x90   : > { %v377_v11 = vadd.f32 %v376_v7, %v373_v6  ;;  %v357_v37 = vstv %s778_s30  ;;  %v360_v38 = vstv %s779_s8  ;;  %v343_v39 = vmul.f32 %v342_v34, %v1365_v0  ;;  %s789_s11 = sld [smem:[#allocation9 + $0x5]]  ;;  %s791_s30 = sld [smem:[#allocation9 + $0x7]] }
  0x91   : > { %v346_v40 = vmul.f32 %v1367_v1, %v345_v35  ;;  %v349_v42 = vstv %s776_s12  ;;  %v358_v43 = vmul.f32 %v357_v37, %v1365_v0  ;;  %v361_v44 = vmul.f32 %v1367_v1, %v360_v38  ;;  %s795_s8 = sld [smem:[#allocation10 + $0x4]]  ;;  %s491_s12 = sld [smem:[#allocation10]] }
  0x92   : > { %v381_v13 = vadd.f32 %v380_v10, %v377_v11  ;;  %v364_v45 = vstv %s780_s13  ;;  %v350_v47 = vmul.f32 %v1369_v2, %v349_v42  ;;  %v353_v48 = vstv %s777_s15  ;;  %s796_s13 = sld [smem:[#allocation10 + $0x5]]  ;;  %s792_s15 = sld [smem:[#allocation10 + $0x1]] }
  0x93   : > { %v347_v46 = vadd.f32 %v346_v40, %v343_v39  ;;  %v362_v49 = vadd.f32 %v361_v44, %v358_v43  ;;  %v365_v50 = vmul.f32 %v1369_v2, %v364_v45  ;;  %v368_v51 = vstv %s781_s27  ;;  %s797_s27 = sld [smem:[#allocation10 + $0x6]]  ;;  %p1510_p2 = scmp.ne.s32.totalorder %s1500_s18, 0 }
  0x94   : > { %v385_v14 = vadd.f32 %v384_v12, %v381_v13  ;;  %v354_v53 = vmul.f32 %v1371_v3, %v353_v48  ;;  %v369_v55 = vmul.f32 %v1371_v3, %v368_v51 }
  0x95   : > { %v351_v52 = vadd.f32 %v350_v47, %v347_v46  ;;  %v366_v54 = vadd.f32 %v365_v50, %v362_v49 }
  0x96   : > { %v387_v15 = vsel %vm386_vm0, %v385_v14, -inf }
  0x97   : > { %388 = vmax.xlane.f32.xlu0 %v387_v15  ;;  %v355_v56 = vadd.f32 %v354_v53, %v351_v52  ;;  %v370_v59 = vadd.f32 %v369_v55, %v366_v54 }
 0x124   : > { %v389_v16 = vpop.xlane.xlu0 %388 }
 0x125   : > { %v390_v17 = vsel %vm386_vm0, %v389_v16, -inf }
 0x126   : > { %v391_v18 = vrot.slane %v390_v17, 4 }
 0x128   : > { %v392_v19 = vmax.f32 %v390_v17, %v391_v18  ;;  %v436_v17 = vstv %s435_s19  ;;  %s793_s19 = sld [smem:[#allocation10 + $0x2]] }
 0x12a   : > { %v393_v20 = vrot.slane %v392_v19, 2 }
 0x12c   : > { %v394_v21 = vmax.f32 %v392_v19, %v393_v20  ;;  %v449_v19 = vstv %s786_s29  ;;  %v462_v20 = vstv %s788_s17  ;;  %s798_s29 = sld [smem:[#allocation10 + $0x7]]  ;;  %s794_s17 = sld [smem:[#allocation10 + $0x3]] }
 0x12e   : > { %v395_v22 = vrot.slane %v394_v21, 1 }
 0x130   : > { %v396_v23 = vmax.f32 %v394_v21, %v395_v22  ;;  %v475_v21 = vstv %s790_s7  ;;  %s521_s7 = sld [smem:[#allocation12]] }
 0x132   : > { %v397_v24 = vsub.f32 %v385_v14, %v396_v23  ;;  %v439_v23 = vstv %s785_s9  ;;  %s799_s9 = sld [smem:[#allocation12 + $0x1]] }
 0x134   : > { %v398_v25 = vmul.f32 1.442695, %v397_v24  ;;  %v452_v24 = vstv %s787_s10  ;;  %s802_s10 = sld [smem:[#allocation12 + $0x4]] }
 0x136   : > { %917 = vpow2.f32 %v398_v25  ;;  %v465_v25 = vstv %s789_s11  ;;  %s803_s11 = sld [smem:[#allocation12 + $0x5]] }
 0x140   : > { %v918_v26 = vpop.eup %917 }
 0x141   : > { %v400_v27 = vsel %vm386_vm0, %v918_v26, 0.0 }
 0x142   : > { %401 = vadd.xlane.f32.xlu0 %v400_v27 }
 0x1cf   : > { %v402_v28 = vpop.xlane.xlu0 %401 }
 0x1d0   : > { %v403_v29 = vsel %vm386_vm0, %v402_v28, 0.0 }
 0x1d1   : > { %v404_v30 = vrot.slane %v403_v29, 4 }
 0x1d3   : > { %v405_v31 = vadd.f32 %v404_v30, %v403_v29 }
 0x1d5   : > { %v406_v32 = vrot.slane %v405_v31, 2 }
 0x1d7   : > { %v407_v33 = vadd.f32 %v406_v32, %v405_v31 }
 0x1d9   : > { %v408_v36 = vrot.slane %v407_v33, 1 }
 0x1db   : > { %v409_v41 = vadd.f32 %v408_v36, %v407_v33 }
 0x1dd   : > { %919 = vrcp.f32 %v409_v41 }
 0x1e7   : > { %v920_v57 = vpop.eup %919 }
 0x1e8   : > { %v412_v58 = vmul.f32 %v920_v57, %v918_v26  ;;  %v478_v26 = vstv %s791_s30  ;;  %v507_v57 = vstv %s795_s8  ;;  %s800_s30 = sld [smem:[#allocation12 + $0x2]]  ;;  %s804_s8 = sld [smem:[#allocation12 + $0x6]] }
 0x1ea   : > { %v413_v60 = vmul.f32 %v412_v58, %v355_v56  ;;  %v424_v62 = vmul.f32 %v412_v58, %v370_v59  ;;  %v492_v58 = vstv %s491_s12  ;;  %s801_s12 = sld [smem:[#allocation12 + $0x3]] }
 0x1ec   : > { %v414_v61 = vsel %vm386_vm0, %v413_v60, 0.0  ;;  %v425_v63 = vsel %vm386_vm0, %v424_v62, 0.0  ;;  %v495_v62 = vstv %s792_s15  ;;  %s815_s15 = sshll.u32 %s1198_s28, 7  ;;  %s617_s28 = scalar_lea.sflag [#allocation4], %s1343_s25 }
 0x1ed   : > { %415 = vadd.xlane.f32.xlu1 %v414_v61  ;;  %v510_v61 = vstv %s796_s13  ;;  %s805_s13 = sld [smem:[#allocation12 + $0x7]] }
 0x1f1   : > { %426 = vadd.xlane.f32.xlu1 %v425_v63 }
 0x27a   : > { %v416_v4 = vpop.xlane.xlu1 %415 }
 0x27b   : > { %v417_v5 = vsel %vm386_vm0, %v416_v4, 0.0 }
 0x27c   : > { %v418_v6 = vrot.slane %v417_v5, 4 }
 0x27e   : > { %v419_v7 = vadd.f32 %v418_v6, %v417_v5  ;;  %v427_v8 = vpop.xlane.xlu1 %426  ;;  %v514_v5 = vstv %s797_s27  ;;  %s333_s27 = scalar_lea.vmem [#allocation13], %s765_s26 }
 0x27f   : > { %v428_v9 = vsel %vm386_vm0, %v427_v8, 0.0 }
 0x280   : > { %v420_v10 = vrot.slane %v419_v7, 2  ;;  %v429_v11 = vrot.slane %v428_v9, 4 }
 0x282   : > { %v421_v12 = vadd.f32 %v420_v10, %v419_v7  ;;  %v430_v13 = vadd.f32 %v429_v11, %v428_v9  ;;  %v499_v10 = vstv %s793_s19  ;;  %s630_s19 = sshll.u32 %s333_s27, 4  ;;  %s1437_s19 = int_to_ptr.vmem [resolvable:$true] %s630_s19 }
 0x283   : > { %s1048_s26 = scalar_lea.vmem %s1437_s19, 128 }
 0x284   : > { %v422_v14 = vrot.slane %v421_v12, 1  ;;  %v431_v15 = vrot.slane %v430_v13, 2  ;;  %p1049_p13 = scmp.ne.s32.totalorder %s1437_s19, %s1048_s26 }
 0x286   : > { %v432_v16 = vadd.f32 %v431_v15, %v430_v13  ;;  %v423_v18 = vadd.f32 %v422_v14, %v421_v12  ;;  %v518_v13 = vstv %s798_s29  ;;  %p1050_p4 = pnand %p1049_p13, %p1510_p2 }
 0x288   : > { %v433_v22 = vrot.slane %v432_v16, 1  ;;  %v437_v28 = vmul.f32 %v436_v17, %v423_v18  ;;  %v450_v29 = vmul.f32 %v449_v19, %v423_v18  ;;  %v463_v30 = vmul.f32 %v462_v20, %v423_v18  ;;  %p1051_p5 = pneg %p1050_p4 }
 0x289   : > { %v476_v31 = vmul.f32 %v475_v21, %v423_v18 }
 0x28a   : > { %v434_v27 = vadd.f32 %v433_v22, %v432_v16 }
 0x28c   : > { %v440_v32 = vmul.f32 %v439_v23, %v434_v27  ;;  %v453_v33 = vmul.f32 %v452_v24, %v434_v27  ;;  %v466_v34 = vmul.f32 %v465_v25, %v434_v27  ;;  %v479_v35 = vmul.f32 %v478_v26, %v434_v27 }
 0x28d   : > { %v522_v24 = vstv %s521_s7  ;;  %v525_v25 = vstv %s799_s9  ;;  %v537_v26 = vstv %s802_s10  ;;  %v540_v27 = vstv %s803_s11  ;;  %s1435_s7 = scalar_lea.hbm %s1491_s6, %s815_s15  ;;  %s1136_s9 = smov [#allocation13]  }
 0x28e   : > { %v441_v36 = vadd.f32 %v440_v32, %v437_v28  ;;  %v454_v37 = vadd.f32 %v453_v33, %v450_v29  ;;  %v467_v38 = vadd.f32 %v466_v34, %v463_v30  ;;  %v480_v39 = vadd.f32 %v479_v35, %v476_v31  ;;  %s1052_s10 = sshll.u32 %s1136_s9, 4  ;;  %s1053_s10 = int_to_ptr.vmem [resolvable:$false] %s1052_s10 }
 0x28f   : > { %s1054_s11 = scalar_lea.vmem %s1053_s10, 256  ;;  %p1055_p9 = scmp.lt.s32.totalorder %s1437_s19, %s1053_s10 }
 0x290   : > { %v442_v40 = vsub.f32 0.0, %v441_v36  ;;  %v455_v41 = vsub.f32 0.0, %v454_v37  ;;  %v468_v42 = vsub.f32 0.0, %v467_v38  ;;  %v481_v43 = vsub.f32 0.0, %v480_v39  ;;  %p1056_p10 = scmp.lt.s32.totalorder %s1054_s11, %s1048_s26 }
 0x292   : > { %v443_v44 = vmul.f32 1.442695, %v442_v40  ;;  %v456_v45 = vmul.f32 1.442695, %v455_v41  ;;  %v469_v46 = vmul.f32 1.442695, %v468_v42  ;;  %v529_v40 = vstv %s800_s30  ;;  %p1057_p11 = por %p1056_p10, %p1055_p9 }
 0x293   : > { %v482_v47 = vmul.f32 1.442695, %v481_v43  ;;  %v544_v41 = vstv %s804_s8 }
 0x294   : > { %921 = vpow2.f32 %v443_v44  ;;  %p1058_p8 = pnand %p1057_p11, %p1051_p5 }
 0x295   : > { %923 = vpow2.f32 %v456_v45 }
 0x296   : > { %925 = vpow2.f32 %v469_v46 }
 0x297   : > { %927 = vpow2.f32 %v482_v47 }
 0x29e   : > { %v922_v48 = vpop.eup %921 }
 0x29f   : > { %v924_v49 = vpop.eup %923  ;;  %v445_v50 = vadd.f32 1.0, %v922_v48 }
 0x2a0   : > { %v926_v51 = vpop.eup %925  ;;  %v458_v52 = vadd.f32 1.0, %v924_v49 }
 0x2a1   : > { %v928_v53 = vpop.eup %927  ;;  %929 = vrcp.f32 %v445_v50  ;;  %v471_v54 = vadd.f32 1.0, %v926_v51  ;;  %v533_v50 = vstv %s801_s12  ;;  %v548_v51 = vstv %s805_s13 }
 0x2a2   : > { %931 = vrcp.f32 %v458_v52  ;;  %v484_v55 = vadd.f32 1.0, %v928_v53 }
 0x2a3   : > { %933 = vrcp.f32 %v471_v54 }
 0x2a4   : > { %935 = vrcp.f32 %v484_v55 }
 0x2ab   : > { %v930_v56 = vpop.eup %929 }
 0x2ac   : > { %v932_v59 = vpop.eup %931  ;;  %v1394_v60 = vmul.f32 %v930_v56, %v1365_v0 }
 0x2ad   : > { %v934_v63 = vpop.eup %933  ;;  %v1397_v4 = vmul.f32 %v932_v59, %v1367_v1  ;;  %v503_v1 = vstv %s794_s17 }
 0x2ae   : > { %v936_v6 = vpop.eup %935  ;;  %v1400_v7 = vmul.f32 %v934_v63, %v1369_v2  ;;  %v508_v8 = vmul.f32 %v507_v57, %v1394_v60  ;;  %v493_v9 = vmul.f32 %v492_v58, %v1394_v60  ;;  %v523_v32 = vmul.f32 %v522_v24, %v1394_v60 }
 0x2af   : > { %v1405_v11 = vmul.f32 %v936_v6, %v1371_v3  ;;  %v511_v0 = vmul.f32 %v510_v61, %v1397_v4  ;;  %v496_v12 = vmul.f32 %v495_v62, %v1397_v4  ;;  %v526_v33 = vmul.f32 %v525_v25, %v1397_v4 }
 0x2b0   : > { %v515_v15 = vmul.f32 %v514_v5, %v1400_v7  ;;  %v500_v2 = vmul.f32 %v499_v10, %v1400_v7  ;;  %v538_v36 = vmul.f32 %v537_v26, %v1394_v60  ;;  %v541_v37 = vmul.f32 %v540_v27, %v1397_v4 }
 0x2b1   : > { %v512_v14 = vadd.f32 %v511_v0, %v508_v8  ;;  %v497_v16 = vadd.f32 %v496_v12, %v493_v9  ;;  %v519_v18 = vmul.f32 %v518_v13, %v1405_v11  ;;  %v504_v20 = vmul.f32 %v503_v1, %v1405_v11 }
 0x2b2   : > { %v527_v44 = vadd.f32 %v526_v33, %v523_v32  ;;  %v542_v45 = vadd.f32 %v541_v37, %v538_v36  ;;  %v530_v48 = vmul.f32 %v529_v40, %v1400_v7  ;;  %v545_v49 = vmul.f32 %v544_v41, %v1400_v7 }
 0x2b3   : > { %v516_v17 = vadd.f32 %v515_v15, %v512_v14  ;;  %v501_v19 = vadd.f32 %v500_v2, %v497_v16  ;;  %v534_v58 = vmul.f32 %v533_v50, %v1405_v11  ;;  %v549_v59 = vmul.f32 %v548_v51, %v1405_v11 }
 0x2b4   : > { %v531_v54 = vadd.f32 %v530_v48, %v527_v44  ;;  %v546_v55 = vadd.f32 %v545_v49, %v542_v45 }
 0x2b5   : > { %v520_v3 = vadd.f32 %v519_v18, %v516_v17  ;;  %v505_v21 = vadd.f32 %v504_v20, %v501_v19 }
 0x2b6   : > { %v535_v63 = vadd.f32 %v534_v58, %v531_v54  ;;  %v550_v5 = vadd.f32 %v549_v59, %v546_v55 }
 0x2b7   : > { %v563_v22 = vsel %vm386_vm0, %v520_v3, 0.0  ;;  %v551_v23 = vsel %vm386_vm0, %v505_v21, 0.0 }
 0x2b8   : > { %564 = vadd.xlane.f32.xlu1 %v563_v22  ;;  %552 = vadd.xlane.f32.xlu0 %v551_v23 }
 0x345   : > { %v565_v28 = vpop.xlane.xlu1 %564  ;;  %v553_v29 = vpop.xlane.xlu0 %552 }
 0x346   : > { %v566_v30 = vsel %vm386_vm0, %v565_v28, 0.0  ;;  %v554_v31 = vsel %vm386_vm0, %v553_v29, 0.0 }
 0x347   : > { %v567_v34 = vrot.slane %v566_v30, 4  ;;  %v555_v35 = vrot.slane %v554_v31, 4 }
 0x349   : > { %v568_v38 = vadd.f32 %v567_v34, %v566_v30  ;;  %v556_v39 = vadd.f32 %v555_v35, %v554_v31 }
 0x34b   : > { %v569_v42 = vrot.slane %v568_v38, 2  ;;  %v557_v43 = vrot.slane %v556_v39, 2 }
 0x34d   : > { %v570_v46 = vadd.f32 %v569_v42, %v568_v38  ;;  %v558_v47 = vadd.f32 %v557_v43, %v556_v39 }
 0x34f   : > { %v571_v52 = vrot.slane %v570_v46, 1  ;;  %v559_v53 = vrot.slane %v558_v47, 1 }
 0x351   : > { %v572_v56 = vadd.f32 %v571_v52, %v570_v46  ;;  %v560_v57 = vadd.f32 %v559_v53, %v558_v47 }
 0x353   : > { %v573_v61 = vmul.f32 0.00390625, %v572_v56  ;;  %v561_v62 = vmul.f32 0.00390625, %v560_v57 }
 0x355   : > { %v562_v6 = vmul.f32 %v561_v62, %v535_v63  ;;  %v574_v8 = vmul.f32 %v573_v61, %v550_v5 }
 0x357   : > { %v575_v9 = vadd.f32 %v574_v8, %v562_v6 }
 0x359   : > { %v576_v10 = vsel %vm386_vm0, %v575_v9, -inf }
 0x35a   : > { %577 = vmax.xlane.f32.xlu0 %v576_v10 }
 0x3e7   : > { %v578_v0 = vpop.xlane.xlu0 %577 }
 0x3e8   : > { %v579_v12 = vsel %vm386_vm0, %v578_v0, -inf }
 0x3e9   : > { %v580_v13 = vrot.slane %v579_v12, 4 }
 0x3eb   : > { %v581_v1 = vmax.f32 %v579_v12, %v580_v13 }
 0x3ed   : > { %v582_v14 = vrot.slane %v581_v1, 2 }
 0x3ef   : > { %v583_v15 = vmax.f32 %v581_v1, %v582_v14 }
 0x3f1   : > { %v584_v16 = vrot.slane %v583_v15, 1 }
 0x3f3   : > { %v585_v2 = vmax.f32 %v583_v15, %v584_v16 }
 0x3f5   : > { %v586_v17 = vsub.f32 %v575_v9, %v585_v2 }
 0x3f7   : > { %v587_v18 = vmul.f32 1.442695, %v586_v17 }
 0x3f9   : > { %937 = vpow2.f32 %v587_v18 }
 0x403   : > { %v938_v19 = vpop.eup %937 }
 0x404   : > { %v589_v20 = vsel %vm386_vm0, %v938_v19, 0.0 }
 0x405   : > { %590 = vadd.xlane.f32.xlu1 %v589_v20 }
 0x492   : > { %v591_v3 = vpop.xlane.xlu1 %590 }
 0x493   : > { %v592_v21 = vsel %vm386_vm0, %v591_v3, 0.0 }
 0x494   : > { %v593_v22 = vrot.slane %v592_v21, 4 }
 0x496   : > { %v594_v23 = vadd.f32 %v593_v22, %v592_v21 }
 0x498   : > { %v595_v24 = vrot.slane %v594_v23, 2 }
 0x49a   : > { %v596_v25 = vadd.f32 %v595_v24, %v594_v23 }
 0x49c   : > { %v597_v26 = vrot.slane %v596_v25, 1 }
 0x49e   : > { %v598_v27 = vadd.f32 %v597_v26, %v596_v25 }
 0x4a0   : > { %939 = vrcp.f32 %v598_v27 }
 0x4aa   : > { %v940_v28 = vpop.eup %939 }
 0x4ab   : > { %v601_v29 = vmul.f32 %v940_v28, %v938_v19 }
 0x4ad   : > { %v602_v30 = vmul.f32 0.5, %v601_v29 }
 0x4af   : > { %941 = vtanh.f32 %v602_v30 }
 0x4b9   : > { %v942_v31 = vpop.eup %941 }
 0x4ba   : > { %v604_v32 = vadd.f32 1.0, %v942_v31 }
 0x4bc   : > { %v605_v33 = vmul.f32 %v604_v32, %v1394_v60  ;;  %v607_v34 = vmul.f32 %v604_v32, %v1397_v4  ;;  %v610_v35 = vmul.f32 %v604_v32, %v1400_v7  ;;  %v613_v36 = vmul.f32 %v604_v32, %v1405_v11 }
 0x4be   : > { %606 = vst [vmem:[%s333_s27] sm:$0x3] %v605_v33  ;;  %806 = vst [vmem:[%s333_s27 + $0x2] sm:$0x3] %v607_v34 }
 0x4bf   : > { %807 = vst [vmem:[%s333_s27 + $0x4] sm:$0x3] %v610_v35  ;;  %808 = vst [vmem:[%s333_s27 + $0x6] sm:$0x3] %v613_v36 }
 0x4c0   : > { %1061 = shalt.err (!%p1058_p8)
}
 0x4c1   : > { %s1062_s30 = scalar_lea.hbm %s1435_s7, 128  ;;  %s1066_s13 = scalar_lea.hbm %s1491_s6, 256 }
 0x4c2   : > { %p1063_p6 = scmp.ne.s32.totalorder %s1435_s7, %s1062_s30  ;;  %p1067_p7 = scmp.lt.u32.totalorder %s1435_s7, %s1491_s6 }
 0x4c3   : > { %p1068_p12 = scmp.lt.u32.totalorder %s1066_s13, %s1062_s30  ;;  %p1070_p13 = scmp.lt.u32.totalorder %s1062_s30, %s1435_s7 }
 0x4c4   : > { %p1064_p1 = pnand %p1063_p6, %p1510_p2 }
 0x4c5   : > { %p1069_p0 = por %p1068_p12, %p1067_p7 }
 0x4c6   : > { %p1065_p3 = pneg %p1064_p1 }
 0x4c7   : > { %p1071_p4 = por %p1070_p13, %p1069_p0 }
 0x4c9   : > { %p1072_p5 = pnand %p1071_p4, %p1065_p3 }
 0x4cb   : > { %1075 = shalt.err (!%p1072_p5)
}
 0x4cc   : > { %s1137_s29 = smov 32   ;;  %s1138_s17 = smov 2  }
 0x4cd   : > { %838 = dma.vmem_to_hbm [thread:$0]  (%p1510_p2), %s1437_s19, 128, %s1435_s7, %s617_s28, %s1137_s29, %s1137_s29, %s1138_s17  }
 0x4ce PF: > { %s645_s26 = sand.u32 1, %s1114_s21   ;;  %p1511_p9 = scmp.ne.s32.totalorder %s1501_s20, 0 }
 0x4cf   : > { %p1512_p10 = scmp.ge.s32.totalorder %s1126_s24, 2  ;;  %s646_s9 = scalar_lea.sflag [#allocation4], %s645_s26 }
 0x4d1   : > { %p861_p11 = pnand %p1512_p10, %p1511_p9 }
 0x4d3   : > { %1109 = dma.done.wait (!%p861_p11), %s646_s9, 128  }
 0x4d4   : > { %1111 = vsyncadd (!%p861_p11), %s646_s9, 4294967168  ;;  %p22_p8 = scmp.ge.s32.totalorder %s1270_s14, 4   ;;  %s1513_s21 = smov %s1118_s22 }
 0x4d5   : > { %s1514_s22 = smov %s1122_s23  ;;  %s1515_s23 = smov %s1282_s16 }
 0x4d6   : > { %s1516_s24 = smov %s1270_s14  ;;  %24 = sbr.rel (!%p22_p8) target bundleno = 8 (0x8), region = 116 }
 0x4dd   :  { %651 = vsyncpa [#allocation3], 1 }
 0x4de   :  { %653 = vsyncpa [#allocation3 + $0x1], 1 }
 0x4df   :  { %654 = vsyncpa [#allocation4], 1 }
 0x4e0   :  { %656 = vsyncpa [#allocation4 + $0x1], 1 }
 0x4e1   :  { %657 = vsyncpa [#allocation5], 1 }
 0x4e2   :  { %659 = vsyncpa [#allocation5 + $0x1], 1 }
 0x4e3   :  { %660 = vsyncpa [#allocation8], 1 }
 0x4e4   :  { %661 = vsyncpa [#allocation11], 1 }

</bundles_post_ra>
